<compile_context>
chip_gen: v5e
topology: v5e:2x2
jax: 0.10.0
libtpu: 0.0.40
codegen_flags: <defaults>
</compile_context>

<pallas_src>
import jax
import jax.numpy as jnp
from jax.experimental import pallas as pl
from jax.experimental.pallas import tpu as pltpu


def _round_up(n, m):
    return ((n + m - 1) // m) * m


def _largest_divisor_le(n, cap):
    for d in range(min(n, cap), 0, -1):
        if n % d == 0:
            return d
    return 1


# ---------------------------------------------------------------------------
# Fused kernel: input projection + time recurrence + FC + softmax per tile.
# Block shapes: x (TT, TB, I), out (TT, TB, Op); h carry in VMEM scratch.
# ---------------------------------------------------------------------------
def _rnn_fused_kernel(x_ref, h0_ref, wih_ref, whh_ref, brnn_ref, wfc_ref, bfc_ref,
                      o_ref, h_scr, seq_scr):
    t = pl.program_id(1)

    @pl.when(t == 0)
    def _():
        h_scr[...] = h0_ref[...]          # re-init carry at the start of each batch block

    TT, TB, I = x_ref.shape
    Hp = h_scr.shape[-1]
    Op = o_ref.shape[-1]

    # (1) Hoisted input projection: one MXU-friendly matmul for the whole time tile.
    xp = jnp.dot(x_ref[...].reshape(TT * TB, I), wih_ref[...],
                 preferred_element_type=jnp.float32) + brnn_ref[...]
    seq_scr[...] = xp.reshape(TT, TB, Hp)

    # (2) Serial recurrence: only h_prev @ W_hh + tanh remain on the chain.
    whh = whh_ref[...]                    # loop-invariant load, hoisted
    for j in range(TT):                   # static unroll (TT <= 32)
        h_new = jnp.tanh(seq_scr[j] +
                         jnp.dot(h_scr[...], whh,
                                 preferred_element_type=jnp.float32))
        h_scr[...] = h_new
        seq_scr[j] = h_new                # reuse the xproj scratch for h_t

    # (3) Fused FC + softmax epilogue over the whole tile (lane-dense Op).
    #     Padded output lanes carry a -1e30 bias -> exp == 0 -> exact softmax over O.
    hs = seq_scr[...].reshape(TT * TB, Hp)
    logits = jnp.dot(hs, wfc_ref[...], preferred_element_type=jnp.float32) + bfc_ref[...]
    m = jnp.max(logits, axis=-1, keepdims=True)
    e = jnp.exp(logits - m)
    probs = e * pl.reciprocal(jnp.sum(e, axis=-1, keepdims=True), approx=True)
    o_ref[...] = probs.reshape(TT, TB, Op).astype(o_ref.dtype)


# ---------------------------------------------------------------------------
# Full model forward
# ---------------------------------------------------------------------------
def rnn_model_forward(x_bti, params):
    """x_bti: (B, T, I) -> (B*T, output_size) softmax probabilities."""
    B, T, I = x_bti.shape
    assert len(params["rnn"]) == 1, "init_hidden() implies n_layers == 1"
    # TODO(synk): stacked RNN layers (n_layers > 1) would need a hidden-output path.
    layer = params["rnn"][0]
    H = layer["w_hh"].shape[0]
    O = params["fc_w"].shape[1]
    Hp = _round_up(H, 128)
    Op = _round_up(O, 128)
    f32 = jnp.float32

    # Zero-pad weights so stores are lane-dense; padded hidden lanes stay exactly 0
    # (their pre-activation is always 0 and tanh(0) = 0), padded fc columns get a
    # -1e30 bias so they vanish in the softmax.
    wih = jnp.zeros((I, Hp), f32).at[:, :H].set(layer["w_ih"].astype(f32))
    whh = jnp.zeros((Hp, Hp), f32).at[:H, :H].set(layer["w_hh"].astype(f32))
    brnn = jnp.zeros((1, Hp), f32).at[:, :H].set(layer["b"].astype(f32))
    h0 = jnp.zeros((B, Hp), f32).at[:, :H].set(layer["h0"].astype(f32))
    wfc = jnp.zeros((Hp, Op), f32).at[:H, :O].set(params["fc_w"].astype(f32))
    bfc = jnp.full((1, Op), -1e30, f32).at[:, :O].set(params["fc_b"].astype(f32))

    TT = _largest_divisor_le(T, 32)       # timesteps per grid step
    TB = 8 if B % 8 == 0 else B           # batch rows per block (sublane aligned)

    # Time-major layout gives contiguous leading-dim access inside the kernel;
    # this single small transpose is the only XLA pass over the raw input.
    x_tbi = jnp.transpose(x_bti, (1, 0, 2)).astype(f32)

    out_tbo = pl.pallas_call(
        _rnn_fused_kernel,
        out_shape=jax.ShapeDtypeStruct((T, B, Op), f32),
        grid_spec=pltpu.PrefetchScalarGridSpec(
            num_scalar_prefetch=0,
            grid=(B // TB, T // TT),
            in_specs=[
                pl.BlockSpec((TT, TB, I), lambda b, t: (t, b, 0)),   # x
                pl.BlockSpec((TB, Hp), lambda b, t: (b, 0)),         # h0
                pl.BlockSpec((I, Hp), lambda b, t: (0, 0)),          # W_ih
                pl.BlockSpec((Hp, Hp), lambda b, t: (0, 0)),         # W_hh
                pl.BlockSpec((1, Hp), lambda b, t: (0, 0)),          # b_ih + b_hh
                pl.BlockSpec((Hp, Op), lambda b, t: (0, 0)),         # W_fc
                pl.BlockSpec((1, Op), lambda b, t: (0, 0)),          # b_fc (+ pad mask)
            ],
            out_specs=pl.BlockSpec((TT, TB, Op), lambda b, t: (t, b, 0)),
            scratch_shapes=[
                pltpu.VMEM((TB, Hp), jnp.float32),        # h carry across time tiles
                pltpu.VMEM((TT, TB, Hp), jnp.float32),    # xproj / h per tile
            ],
        ),
        compiler_params=pltpu.CompilerParams(
            # batch axis is parallel (megacore-safe); the time carry requires
            # the time axis to stay "arbitrary" — never parallelize over T.
            dimension_semantics=("parallel", "arbitrary"),
        ),
    )(x_tbi, h0, wih, whh, brnn, wfc, bfc)

    # (T, B, Op) -> (B*T, O) with batch-major rows, matching outs.view(-1, H) @ fc.
    return jnp.transpose(out_tbo, (1, 0, 2)).reshape(B * T, Op)[:, :O]


def make_params(key, input_size, hidden_dim, output_size, n_layers, batch):
    """Deterministic parameter init mirroring nn.RNN / nn.Linear shapes."""
    keys = jax.random.split(key, 4 * n_layers + 3)
    bound_rnn = 1.0 / jnp.sqrt(hidden_dim)
    layers = []
    for l in range(n_layers):
        in_dim = input_size if l == 0 else hidden_dim
        k_ih, k_hh, k_bih, k_bhh = keys[4 * l: 4 * l + 4]
        # stored pre-transposed: (in_dim, H) and (H, H) so the kernel does x @ W
        w_ih = jax.random.uniform(k_ih, (in_dim, hidden_dim), jnp.float32,
                                  -bound_rnn, bound_rnn)
        w_hh = jax.random.uniform(k_hh, (hidden_dim, hidden_dim), jnp.float32,
                                  -bound_rnn, bound_rnn)
        b_ih = jax.random.uniform(k_bih, (1, hidden_dim), jnp.float32,
                                  -bound_rnn, bound_rnn)
        b_hh = jax.random.uniform(k_bhh, (1, hidden_dim), jnp.float32,
                                  -bound_rnn, bound_rnn)
        layers.append(dict(w_ih=w_ih, w_hh=w_hh, b=b_ih + b_hh))
    # init_hidden(): torch.randn(1, input_size, hidden_dim) -> needs batch == input_size
    k_h0 = keys[4 * n_layers]
    h0_all = jax.random.normal(k_h0, (n_layers, batch, hidden_dim), jnp.float32)
    for l in range(n_layers):
        layers[l]["h0"] = h0_all[l]
    k_fw, k_fb = keys[4 * n_layers + 1], keys[4 * n_layers + 2]
    bound_fc = 1.0 / jnp.sqrt(hidden_dim)
    fc_w = jax.random.uniform(k_fw, (hidden_dim, output_size), jnp.float32,
                              -bound_fc, bound_fc)
    fc_b = jax.random.uniform(k_fb, (1, output_size), jnp.float32,
                              -bound_fc, bound_fc)
    return dict(rnn=layers, fc_w=fc_w, fc_b=fc_b)


def _reference_forward(x_bti, params):
    """Pure-JAX reference for correctness checking."""
    x_tbi = jnp.transpose(x_bti, (1, 0, 2)).astype(jnp.float32)
    h_seq = x_tbi
    for layer in params["rnn"]:
        def step(h, x_t, layer=layer):
            h_new = jnp.tanh(x_t @ layer["w_ih"] + h @ layer["w_hh"] + layer["b"])
            return h_new, h_new
        _, h_seq = jax.lax.scan(step, layer["h0"], h_seq)
    outs = jnp.transpose(h_seq, (1, 0, 2))
    flat = outs.reshape(-1, outs.shape[-1])
    logits = flat @ params["fc_w"] + params["fc_b"]
    return jax.nn.softmax(logits, axis=1)


if __name__ == "__main__":
    # Small shapes; batch must equal input_size to match init_hidden(), n_layers = 1.
    INPUT_SIZE = 8
    BATCH = INPUT_SIZE
    SEQ = 8
    HIDDEN = 32
    OUTPUT = 16
    N_LAYERS = 1

    key = jax.random.PRNGKey(0)
    k_x, k_p = jax.random.split(key)
    x = jax.random.normal(k_x, (BATCH, SEQ, INPUT_SIZE), jnp.float32)
    params = make_params(k_p, INPUT_SIZE, HIDDEN, OUTPUT, N_LAYERS, BATCH)

    fwd = jax.jit(rnn_model_forward)
    out = jax.block_until_ready(fwd(x, params))

    ref = _reference_forward(x, params)
    assert out.shape == (BATCH * SEQ, OUTPUT), out.shape
    # 2e-3 tolerance leaves margin for the EUP approx reciprocal in the softmax.
    assert jnp.allclose(out, ref, rtol=2e-3, atol=2e-3), "mismatch vs reference"
    print("KERNEL_OK")
</pallas_src>

<mosaic_0001>
module attributes {stable_mosaic.version = 11 : i64} {
  func.func @_rnn_fused_kernel(%arg0: i32, %arg1: i32, %arg2: memref<8x8x8xf32, #tpu.memory_space<vmem>>, %arg3: memref<8x128xf32, #tpu.memory_space<vmem>>, %arg4: memref<8x128xf32, #tpu.memory_space<vmem>>, %arg5: memref<128x128xf32, #tpu.memory_space<vmem>>, %arg6: memref<1x128xf32, #tpu.memory_space<vmem>>, %arg7: memref<128x128xf32, #tpu.memory_space<vmem>>, %arg8: memref<1x128xf32, #tpu.memory_space<vmem>>, %arg9: memref<8x8x128xf32, #tpu.memory_space<vmem>>, %arg10: memref<8x128xf32, #tpu.memory_space<vmem>>, %arg11: memref<8x8x128xf32, #tpu.memory_space<vmem>>) attributes {dimension_semantics = [#tpu.dimension_semantics<parallel>, #tpu.dimension_semantics<arbitrary>], iteration_bounds = array<i64: 1, 1>, scalar_prefetch = 0 : i64, scratch_operands = 2 : i64, tpu.core_type = #tpu.core_type<tc>, window_params = [{transform_indices = @transform_0, window_bounds = array<i64: 8, 8, 8>}, {transform_indices = @transform_1, window_bounds = array<i64: 8, 128>}, {pipeline_mode = #tpu.pipeline_mode<synchronous>, transform_indices = @transform_2, window_bounds = array<i64: 8, 128>}, {pipeline_mode = #tpu.pipeline_mode<synchronous>, transform_indices = @transform_3, window_bounds = array<i64: 128, 128>}, {pipeline_mode = #tpu.pipeline_mode<synchronous>, transform_indices = @transform_4, window_bounds = array<i64: 1, 128>}, {pipeline_mode = #tpu.pipeline_mode<synchronous>, transform_indices = @transform_5, window_bounds = array<i64: 128, 128>}, {pipeline_mode = #tpu.pipeline_mode<synchronous>, transform_indices = @transform_6, window_bounds = array<i64: 1, 128>}, {transform_indices = @transform_7, window_bounds = array<i64: 8, 8, 128>}]} {
    %c0_i32 = arith.constant 0 : i32
    %0 = arith.cmpi eq, %arg1, %c0_i32 : i32
    %1 = arith.extui %0 : i1 to i32
    %c0_i32_0 = arith.constant 0 : i32
    %2 = arith.cmpi ne, %1, %c0_i32_0 : i32
    scf.if %2 {
      %c0_106 = arith.constant 0 : index
      %c0_107 = arith.constant 0 : index
      %112 = vector.load %arg3[%c0_106, %c0_107] : memref<8x128xf32, #tpu.memory_space<vmem>>, vector<8x128xf32>
      %c0_108 = arith.constant 0 : index
      %c0_109 = arith.constant 0 : index
      %113 = vector.load %arg10[%c0_108, %c0_109] : memref<8x128xf32, #tpu.memory_space<vmem>>, vector<8x128xf32>
      tpu.vector_store %arg10[%c0_108, %c0_109], %112 {strides = array<i32>} : memref<8x128xf32, #tpu.memory_space<vmem>>, vector<8x128xf32>,
    } else {
    }
    %c0 = arith.constant 0 : index
    %c0_1 = arith.constant 0 : index
    %c0_2 = arith.constant 0 : index
    %3 = vector.load %arg2[%c0, %c0_1, %c0_2] : memref<8x8x8xf32, #tpu.memory_space<vmem>>, vector<8x8x8xf32>
    %4 = vector.shape_cast %3 : vector<8x8x8xf32> to vector<64x8xf32>
    %c0_3 = arith.constant 0 : index
    %c0_4 = arith.constant 0 : index
    %5 = vector.load %arg4[%c0_3, %c0_4] : memref<8x128xf32, #tpu.memory_space<vmem>>, vector<8x128xf32>
    %cst = arith.constant dense<0.000000e+00> : vector<64x128xf32>
    %6 = tpu.matmul %4, %5, %cst {dimension_numbers = #tpu.dot_dimension_numbers<[1], [0], [0], [1], [0, 0, 1, 1], [], []>} : vector<64x8xf32>, vector<8x128xf32>, vector<64x128xf32> -> vector<64x128xf32>
    %c0_5 = arith.constant 0 : index
    %c0_6 = arith.constant 0 : index
    %7 = vector.load %arg6[%c0_5, %c0_6] : memref<1x128xf32, #tpu.memory_space<vmem>>, vector<1x128xf32>
    %8 = vector.broadcast %7 : vector<1x128xf32> to vector<64x128xf32>
    %9 = arith.addf %6, %8 : vector<64x128xf32>
    %10 = vector.shape_cast %9 : vector<64x128xf32> to vector<8x8x128xf32>
    %c0_7 = arith.constant 0 : index
    %c0_8 = arith.constant 0 : index
    %c0_9 = arith.constant 0 : index
    %11 = vector.load %arg11[%c0_7, %c0_8, %c0_9] : memref<8x8x128xf32, #tpu.memory_space<vmem>>, vector<8x8x128xf32>
    tpu.vector_store %arg11[%c0_7, %c0_8, %c0_9], %10 {strides = array<i32>} : memref<8x8x128xf32, #tpu.memory_space<vmem>>, vector<8x8x128xf32>,
    %c0_10 = arith.constant 0 : index
    %c0_11 = arith.constant 0 : index
    %12 = vector.load %arg5[%c0_10, %c0_11] : memref<128x128xf32, #tpu.memory_space<vmem>>, vector<128x128xf32>
    %c0_12 = arith.constant 0 : index
    %c0_13 = arith.constant 0 : index
    %c0_14 = arith.constant 0 : index
    %13 = vector.load %arg11[%c0_12, %c0_13, %c0_14] : memref<8x8x128xf32, #tpu.memory_space<vmem>>, vector<1x8x128xf32>
    %14 = vector.shape_cast %13 : vector<1x8x128xf32> to vector<8x128xf32>
    %c0_15 = arith.constant 0 : index
    %c0_16 = arith.constant 0 : index
    %15 = vector.load %arg10[%c0_15, %c0_16] : memref<8x128xf32, #tpu.memory_space<vmem>>, vector<8x128xf32>
    %cst_17 = arith.constant dense<0.000000e+00> : vector<8x128xf32>
    %16 = tpu.matmul %15, %12, %cst_17 {dimension_numbers = #tpu.dot_dimension_numbers<[1], [0], [0], [1], [0, 0, 1, 1], [], []>} : vector<8x128xf32>, vector<128x128xf32>, vector<8x128xf32> -> vector<8x128xf32>
    %17 = arith.addf %14, %16 : vector<8x128xf32>
    %18 = math.tanh %17 : vector<8x128xf32>
    %c0_18 = arith.constant 0 : index
    %c0_19 = arith.constant 0 : index
    %19 = vector.load %arg10[%c0_18, %c0_19] : memref<8x128xf32, #tpu.memory_space<vmem>>, vector<8x128xf32>
    tpu.vector_store %arg10[%c0_18, %c0_19], %18 {strides = array<i32>} : memref<8x128xf32, #tpu.memory_space<vmem>>, vector<8x128xf32>,
    %c0_20 = arith.constant 0 : index
    %c0_21 = arith.constant 0 : index
    %c0_22 = arith.constant 0 : index
    %20 = vector.load %arg11[%c0_20, %c0_21, %c0_22] : memref<8x8x128xf32, #tpu.memory_space<vmem>>, vector<1x8x128xf32>
    %21 = vector.shape_cast %20 : vector<1x8x128xf32> to vector<8x128xf32>
    %22 = vector.shape_cast %18 : vector<8x128xf32> to vector<1x8x128xf32>
    tpu.vector_store %arg11[%c0_20, %c0_21, %c0_22], %22 {strides = array<i32>} : memref<8x8x128xf32, #tpu.memory_space<vmem>>, vector<1x8x128xf32>,
    %c1 = arith.constant 1 : index
    %c0_23 = arith.constant 0 : index
    %c0_24 = arith.constant 0 : index
    %23 = vector.load %arg11[%c1, %c0_23, %c0_24] : memref<8x8x128xf32, #tpu.memory_space<vmem>>, vector<1x8x128xf32>
    %24 = vector.shape_cast %23 : vector<1x8x128xf32> to vector<8x128xf32>
    %c0_25 = arith.constant 0 : index
    %c0_26 = arith.constant 0 : index
    %25 = vector.load %arg10[%c0_25, %c0_26] : memref<8x128xf32, #tpu.memory_space<vmem>>, vector<8x128xf32>
    %cst_27 = arith.constant dense<0.000000e+00> : vector<8x128xf32>
    %26 = tpu.matmul %25, %12, %cst_27 {dimension_numbers = #tpu.dot_dimension_numbers<[1], [0], [0], [1], [0, 0, 1, 1], [], []>} : vector<8x128xf32>, vector<128x128xf32>, vector<8x128xf32> -> vector<8x128xf32>
    %27 = arith.addf %24, %26 : vector<8x128xf32>
    %28 = math.tanh %27 : vector<8x128xf32>
    %c0_28 = arith.constant 0 : index
    %c0_29 = arith.constant 0 : index
    %29 = vector.load %arg10[%c0_28, %c0_29] : memref<8x128xf32, #tpu.memory_space<vmem>>, vector<8x128xf32>
    tpu.vector_store %arg10[%c0_28, %c0_29], %28 {strides = array<i32>} : memref<8x128xf32, #tpu.memory_space<vmem>>, vector<8x128xf32>,
    %c1_30 = arith.constant 1 : index
    %c0_31 = arith.constant 0 : index
    %c0_32 = arith.constant 0 : index
    %30 = vector.load %arg11[%c1_30, %c0_31, %c0_32] : memref<8x8x128xf32, #tpu.memory_space<vmem>>, vector<1x8x128xf32>
    %31 = vector.shape_cast %30 : vector<1x8x128xf32> to vector<8x128xf32>
    %32 = vector.shape_cast %28 : vector<8x128xf32> to vector<1x8x128xf32>
    tpu.vector_store %arg11[%c1_30, %c0_31, %c0_32], %32 {strides = array<i32>} : memref<8x8x128xf32, #tpu.memory_space<vmem>>, vector<1x8x128xf32>,
    %c2 = arith.constant 2 : index
    %c0_33 = arith.constant 0 : index
    %c0_34 = arith.constant 0 : index
    %33 = vector.load %arg11[%c2, %c0_33, %c0_34] : memref<8x8x128xf32, #tpu.memory_space<vmem>>, vector<1x8x128xf32>
    %34 = vector.shape_cast %33 : vector<1x8x128xf32> to vector<8x128xf32>
    %c0_35 = arith.constant 0 : index
    %c0_36 = arith.constant 0 : index
    %35 = vector.load %arg10[%c0_35, %c0_36] : memref<8x128xf32, #tpu.memory_space<vmem>>, vector<8x128xf32>
    %cst_37 = arith.constant dense<0.000000e+00> : vector<8x128xf32>
    %36 = tpu.matmul %35, %12, %cst_37 {dimension_numbers = #tpu.dot_dimension_numbers<[1], [0], [0], [1], [0, 0, 1, 1], [], []>} : vector<8x128xf32>, vector<128x128xf32>, vector<8x128xf32> -> vector<8x128xf32>
    %37 = arith.addf %34, %36 : vector<8x128xf32>
    %38 = math.tanh %37 : vector<8x128xf32>
    %c0_38 = arith.constant 0 : index
    %c0_39 = arith.constant 0 : index
    %39 = vector.load %arg10[%c0_38, %c0_39] : memref<8x128xf32, #tpu.memory_space<vmem>>, vector<8x128xf32>
    tpu.vector_store %arg10[%c0_38, %c0_39], %38 {strides = array<i32>} : memref<8x128xf32, #tpu.memory_space<vmem>>, vector<8x128xf32>,
    %c2_40 = arith.constant 2 : index
    %c0_41 = arith.constant 0 : index
    %c0_42 = arith.constant 0 : index
    %40 = vector.load %arg11[%c2_40, %c0_41, %c0_42] : memref<8x8x128xf32, #tpu.memory_space<vmem>>, vector<1x8x128xf32>
    %41 = vector.shape_cast %40 : vector<1x8x128xf32> to vector<8x128xf32>
    %42 = vector.shape_cast %38 : vector<8x128xf32> to vector<1x8x128xf32>
    tpu.vector_store %arg11[%c2_40, %c0_41, %c0_42], %42 {strides = array<i32>} : memref<8x8x128xf32, #tpu.memory_space<vmem>>, vector<1x8x128xf32>,
    %c3 = arith.constant 3 : index
    %c0_43 = arith.constant 0 : index
    %c0_44 = arith.constant 0 : index
    %43 = vector.load %arg11[%c3, %c0_43, %c0_44] : memref<8x8x128xf32, #tpu.memory_space<vmem>>, vector<1x8x128xf32>
    %44 = vector.shape_cast %43 : vector<1x8x128xf32> to vector<8x128xf32>
    %c0_45 = arith.constant 0 : index
    %c0_46 = arith.constant 0 : index
    %45 = vector.load %arg10[%c0_45, %c0_46] : memref<8x128xf32, #tpu.memory_space<vmem>>, vector<8x128xf32>
    %cst_47 = arith.constant dense<0.000000e+00> : vector<8x128xf32>
    %46 = tpu.matmul %45, %12, %cst_47 {dimension_numbers = #tpu.dot_dimension_numbers<[1], [0], [0], [1], [0, 0, 1, 1], [], []>} : vector<8x128xf32>, vector<128x128xf32>, vector<8x128xf32> -> vector<8x128xf32>
    %47 = arith.addf %44, %46 : vector<8x128xf32>
    %48 = math.tanh %47 : vector<8x128xf32>
    %c0_48 = arith.constant 0 : index
    %c0_49 = arith.constant 0 : index
    %49 = vector.load %arg10[%c0_48, %c0_49] : memref<8x128xf32, #tpu.memory_space<vmem>>, vector<8x128xf32>
    tpu.vector_store %arg10[%c0_48, %c0_49], %48 {strides = array<i32>} : memref<8x128xf32, #tpu.memory_space<vmem>>, vector<8x128xf32>,
    %c3_50 = arith.constant 3 : index
    %c0_51 = arith.constant 0 : index
    %c0_52 = arith.constant 0 : index
    %50 = vector.load %arg11[%c3_50, %c0_51, %c0_52] : memref<8x8x128xf32, #tpu.memory_space<vmem>>, vector<1x8x128xf32>
    %51 = vector.shape_cast %50 : vector<1x8x128xf32> to vector<8x128xf32>
    %52 = vector.shape_cast %48 : vector<8x128xf32> to vector<1x8x128xf32>
    tpu.vector_store %arg11[%c3_50, %c0_51, %c0_52], %52 {strides = array<i32>} : memref<8x8x128xf32, #tpu.memory_space<vmem>>, vector<1x8x128xf32>,
    %c4 = arith.constant 4 : index
    %c0_53 = arith.constant 0 : index
    %c0_54 = arith.constant 0 : index
    %53 = vector.load %arg11[%c4, %c0_53, %c0_54] : memref<8x8x128xf32, #tpu.memory_space<vmem>>, vector<1x8x128xf32>
    %54 = vector.shape_cast %53 : vector<1x8x128xf32> to vector<8x128xf32>
    %c0_55 = arith.constant 0 : index
    %c0_56 = arith.constant 0 : index
    %55 = vector.load %arg10[%c0_55, %c0_56] : memref<8x128xf32, #tpu.memory_space<vmem>>, vector<8x128xf32>
    %cst_57 = arith.constant dense<0.000000e+00> : vector<8x128xf32>
    %56 = tpu.matmul %55, %12, %cst_57 {dimension_numbers = #tpu.dot_dimension_numbers<[1], [0], [0], [1], [0, 0, 1, 1], [], []>} : vector<8x128xf32>, vector<128x128xf32>, vector<8x128xf32> -> vector<8x128xf32>
    %57 = arith.addf %54, %56 : vector<8x128xf32>
    %58 = math.tanh %57 : vector<8x128xf32>
    %c0_58 = arith.constant 0 : index
    %c0_59 = arith.constant 0 : index
    %59 = vector.load %arg10[%c0_58, %c0_59] : memref<8x128xf32, #tpu.memory_space<vmem>>, vector<8x128xf32>
    tpu.vector_store %arg10[%c0_58, %c0_59], %58 {strides = array<i32>} : memref<8x128xf32, #tpu.memory_space<vmem>>, vector<8x128xf32>,
    %c4_60 = arith.constant 4 : index
    %c0_61 = arith.constant 0 : index
    %c0_62 = arith.constant 0 : index
    %60 = vector.load %arg11[%c4_60, %c0_61, %c0_62] : memref<8x8x128xf32, #tpu.memory_space<vmem>>, vector<1x8x128xf32>
    %61 = vector.shape_cast %60 : vector<1x8x128xf32> to vector<8x128xf32>
    %62 = vector.shape_cast %58 : vector<8x128xf32> to vector<1x8x128xf32>
    tpu.vector_store %arg11[%c4_60, %c0_61, %c0_62], %62 {strides = array<i32>} : memref<8x8x128xf32, #tpu.memory_space<vmem>>, vector<1x8x128xf32>,
    %c5 = arith.constant 5 : index
    %c0_63 = arith.constant 0 : index
    %c0_64 = arith.constant 0 : index
    %63 = vector.load %arg11[%c5, %c0_63, %c0_64] : memref<8x8x128xf32, #tpu.memory_space<vmem>>, vector<1x8x128xf32>
    %64 = vector.shape_cast %63 : vector<1x8x128xf32> to vector<8x128xf32>
    %c0_65 = arith.constant 0 : index
    %c0_66 = arith.constant 0 : index
    %65 = vector.load %arg10[%c0_65, %c0_66] : memref<8x128xf32, #tpu.memory_space<vmem>>, vector<8x128xf32>
    %cst_67 = arith.constant dense<0.000000e+00> : vector<8x128xf32>
    %66 = tpu.matmul %65, %12, %cst_67 {dimension_numbers = #tpu.dot_dimension_numbers<[1], [0], [0], [1], [0, 0, 1, 1], [], []>} : vector<8x128xf32>, vector<128x128xf32>, vector<8x128xf32> -> vector<8x128xf32>
    %67 = arith.addf %64, %66 : vector<8x128xf32>
    %68 = math.tanh %67 : vector<8x128xf32>
    %c0_68 = arith.constant 0 : index
    %c0_69 = arith.constant 0 : index
    %69 = vector.load %arg10[%c0_68, %c0_69] : memref<8x128xf32, #tpu.memory_space<vmem>>, vector<8x128xf32>
    tpu.vector_store %arg10[%c0_68, %c0_69], %68 {strides = array<i32>} : memref<8x128xf32, #tpu.memory_space<vmem>>, vector<8x128xf32>,
    %c5_70 = arith.constant 5 : index
    %c0_71 = arith.constant 0 : index
    %c0_72 = arith.constant 0 : index
    %70 = vector.load %arg11[%c5_70, %c0_71, %c0_72] : memref<8x8x128xf32, #tpu.memory_space<vmem>>, vector<1x8x128xf32>
    %71 = vector.shape_cast %70 : vector<1x8x128xf32> to vector<8x128xf32>
    %72 = vector.shape_cast %68 : vector<8x128xf32> to vector<1x8x128xf32>
    tpu.vector_store %arg11[%c5_70, %c0_71, %c0_72], %72 {strides = array<i32>} : memref<8x8x128xf32, #tpu.memory_space<vmem>>, vector<1x8x128xf32>,
    %c6 = arith.constant 6 : index
    %c0_73 = arith.constant 0 : index
    %c0_74 = arith.constant 0 : index
    %73 = vector.load %arg11[%c6, %c0_73, %c0_74] : memref<8x8x128xf32, #tpu.memory_space<vmem>>, vector<1x8x128xf32>
    %74 = vector.shape_cast %73 : vector<1x8x128xf32> to vector<8x128xf32>
    %c0_75 = arith.constant 0 : index
    %c0_76 = arith.constant 0 : index
    %75 = vector.load %arg10[%c0_75, %c0_76] : memref<8x128xf32, #tpu.memory_space<vmem>>, vector<8x128xf32>
    %cst_77 = arith.constant dense<0.000000e+00> : vector<8x128xf32>
    %76 = tpu.matmul %75, %12, %cst_77 {dimension_numbers = #tpu.dot_dimension_numbers<[1], [0], [0], [1], [0, 0, 1, 1], [], []>} : vector<8x128xf32>, vector<128x128xf32>, vector<8x128xf32> -> vector<8x128xf32>
    %77 = arith.addf %74, %76 : vector<8x128xf32>
    %78 = math.tanh %77 : vector<8x128xf32>
    %c0_78 = arith.constant 0 : index
    %c0_79 = arith.constant 0 : index
    %79 = vector.load %arg10[%c0_78, %c0_79] : memref<8x128xf32, #tpu.memory_space<vmem>>, vector<8x128xf32>
    tpu.vector_store %arg10[%c0_78, %c0_79], %78 {strides = array<i32>} : memref<8x128xf32, #tpu.memory_space<vmem>>, vector<8x128xf32>,
    %c6_80 = arith.constant 6 : index
    %c0_81 = arith.constant 0 : index
    %c0_82 = arith.constant 0 : index
    %80 = vector.load %arg11[%c6_80, %c0_81, %c0_82] : memref<8x8x128xf32, #tpu.memory_space<vmem>>, vector<1x8x128xf32>
    %81 = vector.shape_cast %80 : vector<1x8x128xf32> to vector<8x128xf32>
    %82 = vector.shape_cast %78 : vector<8x128xf32> to vector<1x8x128xf32>
    tpu.vector_store %arg11[%c6_80, %c0_81, %c0_82], %82 {strides = array<i32>} : memref<8x8x128xf32, #tpu.memory_space<vmem>>, vector<1x8x128xf32>,
    %c7 = arith.constant 7 : index
    %c0_83 = arith.constant 0 : index
    %c0_84 = arith.constant 0 : index
    %83 = vector.load %arg11[%c7, %c0_83, %c0_84] : memref<8x8x128xf32, #tpu.memory_space<vmem>>, vector<1x8x128xf32>
    %84 = vector.shape_cast %83 : vector<1x8x128xf32> to vector<8x128xf32>
    %c0_85 = arith.constant 0 : index
    %c0_86 = arith.constant 0 : index
    %85 = vector.load %arg10[%c0_85, %c0_86] : memref<8x128xf32, #tpu.memory_space<vmem>>, vector<8x128xf32>
    %cst_87 = arith.constant dense<0.000000e+00> : vector<8x128xf32>
    %86 = tpu.matmul %85, %12, %cst_87 {dimension_numbers = #tpu.dot_dimension_numbers<[1], [0], [0], [1], [0, 0, 1, 1], [], []>} : vector<8x128xf32>, vector<128x128xf32>, vector<8x128xf32> -> vector<8x128xf32>
    %87 = arith.addf %84, %86 : vector<8x128xf32>
    %88 = math.tanh %87 : vector<8x128xf32>
    %c0_88 = arith.constant 0 : index
    %c0_89 = arith.constant 0 : index
    %89 = vector.load %arg10[%c0_88, %c0_89] : memref<8x128xf32, #tpu.memory_space<vmem>>, vector<8x128xf32>
    tpu.vector_store %arg10[%c0_88, %c0_89], %88 {strides = array<i32>} : memref<8x128xf32, #tpu.memory_space<vmem>>, vector<8x128xf32>,
    %c7_90 = arith.constant 7 : index
    %c0_91 = arith.constant 0 : index
    %c0_92 = arith.constant 0 : index
    %90 = vector.load %arg11[%c7_90, %c0_91, %c0_92] : memref<8x8x128xf32, #tpu.memory_space<vmem>>, vector<1x8x128xf32>
    %91 = vector.shape_cast %90 : vector<1x8x128xf32> to vector<8x128xf32>
    %92 = vector.shape_cast %88 : vector<8x128xf32> to vector<1x8x128xf32>
    tpu.vector_store %arg11[%c7_90, %c0_91, %c0_92], %92 {strides = array<i32>} : memref<8x8x128xf32, #tpu.memory_space<vmem>>, vector<1x8x128xf32>,
    %c0_93 = arith.constant 0 : index
    %c0_94 = arith.constant 0 : index
    %c0_95 = arith.constant 0 : index
    %93 = vector.load %arg11[%c0_93, %c0_94, %c0_95] : memref<8x8x128xf32, #tpu.memory_space<vmem>>, vector<8x8x128xf32>
    %94 = vector.shape_cast %93 : vector<8x8x128xf32> to vector<64x128xf32>
    %c0_96 = arith.constant 0 : index
    %c0_97 = arith.constant 0 : index
    %95 = vector.load %arg7[%c0_96, %c0_97] : memref<128x128xf32, #tpu.memory_space<vmem>>, vector<128x128xf32>
    %cst_98 = arith.constant dense<0.000000e+00> : vector<64x128xf32>
    %96 = tpu.matmul %94, %95, %cst_98 {dimension_numbers = #tpu.dot_dimension_numbers<[1], [0], [0], [1], [0, 0, 1, 1], [], []>} : vector<64x128xf32>, vector<128x128xf32>, vector<64x128xf32> -> vector<64x128xf32>
    %c0_99 = arith.constant 0 : index
    %c0_100 = arith.constant 0 : index
    %97 = vector.load %arg8[%c0_99, %c0_100] : memref<1x128xf32, #tpu.memory_space<vmem>>, vector<1x128xf32>
    %98 = vector.broadcast %97 : vector<1x128xf32> to vector<64x128xf32>
    %99 = arith.addf %96, %98 : vector<64x128xf32>
    %cst_101 = arith.constant dense<0xFF800000> : vector<64xf32>
    %100 = vector.multi_reduction <maximumf>, %99, %cst_101 [1] : vector<64x128xf32> to vector<64xf32>
    %101 = vector.shape_cast %100 : vector<64xf32> to vector<64x1xf32>
    %102 = vector.broadcast %101 : vector<64x1xf32> to vector<64x128xf32>
    %103 = arith.subf %99, %102 : vector<64x128xf32>
    %104 = math.exp %103 : vector<64x128xf32>
    %cst_102 = arith.constant dense<0.000000e+00> : vector<64xf32>
    %105 = vector.multi_reduction <add>, %104, %cst_102 [1] : vector<64x128xf32> to vector<64xf32>
    %106 = vector.shape_cast %105 : vector<64xf32> to vector<64x1xf32>
    %107 = tpu.reciprocal %106 {approx = true} : vector<64x1xf32> -> vector<64x1xf32>
    %108 = vector.broadcast %107 : vector<64x1xf32> to vector<64x128xf32>
    %109 = arith.mulf %104, %108 : vector<64x128xf32>
    %110 = vector.shape_cast %109 : vector<64x128xf32> to vector<8x8x128xf32>
    %c0_103 = arith.constant 0 : index
    %c0_104 = arith.constant 0 : index
    %c0_105 = arith.constant 0 : index
    %111 = vector.load %arg9[%c0_103, %c0_104, %c0_105] : memref<8x8x128xf32, #tpu.memory_space<vmem>>, vector<8x8x128xf32>
    tpu.vector_store %arg9[%c0_103, %c0_104, %c0_105], %110 {strides = array<i32>} : memref<8x8x128xf32, #tpu.memory_space<vmem>>, vector<8x8x128xf32>,
    return
  }
  func.func @transform_0(%arg0: i32, %arg1: i32) -> (i32, i32, i32) {
    %c0_i32 = arith.constant 0 : i32
    %c0_i32_0 = arith.constant 0 : i32
    return %arg1, %arg0, %c0_i32 : i32, i32, i32
  }
  func.func @transform_1(%arg0: i32, %arg1: i32) -> (i32, i32) {
    %c0_i32 = arith.constant 0 : i32
    %c0_i32_0 = arith.constant 0 : i32
    return %arg0, %c0_i32 : i32, i32
  }
  func.func @transform_2(%arg0: i32, %arg1: i32) -> (i32, i32) {
    %c0_i32 = arith.constant 0 : i32
    %c0_i32_0 = arith.constant 0 : i32
    %c0_i32_1 = arith.constant 0 : i32
    return %c0_i32, %c0_i32_0 : i32, i32
  }
  func.func @transform_3(%arg0: i32, %arg1: i32) -> (i32, i32) {
    %c0_i32 = arith.constant 0 : i32
    %c0_i32_0 = arith.constant 0 : i32
    %c0_i32_1 = arith.constant 0 : i32
    return %c0_i32, %c0_i32_0 : i32, i32
  }
  func.func @transform_4(%arg0: i32, %arg1: i32) -> (i32, i32) {
    %c0_i32 = arith.constant 0 : i32
    %c0_i32_0 = arith.constant 0 : i32
    %c0_i32_1 = arith.constant 0 : i32
    return %c0_i32, %c0_i32_0 : i32, i32
  }
  func.func @transform_5(%arg0: i32, %arg1: i32) -> (i32, i32) {
    %c0_i32 = arith.constant 0 : i32
    %c0_i32_0 = arith.constant 0 : i32
    %c0_i32_1 = arith.constant 0 : i32
    return %c0_i32, %c0_i32_0 : i32, i32
  }
  func.func @transform_6(%arg0: i32, %arg1: i32) -> (i32, i32) {
    %c0_i32 = arith.constant 0 : i32
    %c0_i32_0 = arith.constant 0 : i32
    %c0_i32_1 = arith.constant 0 : i32
    return %c0_i32, %c0_i32_0 : i32, i32
  }
  func.func @transform_7(%arg0: i32, %arg1: i32) -> (i32, i32, i32) {
    %c0_i32 = arith.constant 0 : i32
    %c0_i32_0 = arith.constant 0 : i32
    return %arg1, %arg0, %c0_i32 : i32, i32, i32
  }
}

</mosaic_0001>

<bundles_post_ra>
// kernel: rnn_model_forward.1
= control target key start
LH: loop header
LB: loop body
LE: loop exit
PB: predicated region body
PF: predicated region fallthrough
CT: control target
= control target key end

     0   :  { %vm45_vm0 = vcmask 64512   ;;  %s964_s3 = inlined_call_operand.vmem [shape: f32[128,128], index: 3, kind: input, shape index: {}]   ;;  %s965_s2 = inlined_call_operand.vmem [shape: f32[8,128], index: 2, kind: input, shape index: {}]   ;;  %s966_s0 = inlined_call_operand.vmem [shape: f32[8,8,8], index: 0, kind: input, shape index: {}]   ;;  %s967_s5 = inlined_call_operand.vmem [shape: f32[128,128], index: 5, kind: input, shape index: {}]   ;;  %s968_s4 = inlined_call_operand.vmem [shape: f32[1,128], index: 4, kind: input, shape index: {}]   ;;  %s969_s1 = inlined_call_operand.vmem [shape: f32[8,128], index: 1, kind: input, shape index: {}]   ;;  %s970_s6 = inlined_call_operand.vmem [shape: f32[1,128], index: 6, kind: input, shape index: {}]   ;;  %s971_s7 = inlined_call_operand.vmem [shape: f32[8,8,128], index: 7, kind: output, shape index: {}]  }
   0x1   :  { %v605_v0 = vld [vmem:[%s964_s3 + $0x78] sm:$0xff]  ;;  %v610_v1 = vld [vmem:[%s964_s3 + $0x70] sm:$0xff]  ;;  %v617_v2 = vld [vmem:[%s964_s3 + $0x68] sm:$0xff] }
   0x2   :  { %137 = vmatpush.msra.mxu1 %v605_v0  ;;  %164 = vmatpush.msra.mxu3 %v605_v0  ;;  %v624_v3 = vld [vmem:[%s964_s3 + $0x60] sm:$0xff]  ;;  %v636_v6 = vld [vmem:[%s964_s3 + $0x58] sm:$0xff]  ;;  %v372_v9 = vld [vmem:[%s967_s5 + $0x70] sm:$0xff] }
   0x3   :  { %v40_v4 = vld [vmem:[%s965_s2] sm:$0xff]  ;;  %v373_v8 = vld [vmem:[%s967_s5 + $0x78] sm:$0xff]  ;;  %v653_v10 = vld [vmem:[%s964_s3 + $0x50] sm:$0xff] }
   0x4   :  { %138 = vmatpush.msra.mxu1 %v610_v1  ;;  %165 = vmatpush.msra.mxu3 %v610_v1  ;;  %v32_v5 = vld [vmem:[%s966_s0] sm:$0xff]  ;;  %v371_v11 = vld [vmem:[%s967_s5 + $0x68] sm:$0xff]  ;;  %v369_v16 = vld [vmem:[%s967_s5 + $0x58] sm:$0xff] }
   0x5   :  { %85 = vmatpush.msra.mxu0 %v40_v4  ;;  %511 = vmatpush.msra.mxu2 %v40_v4  ;;  %v36_v7 = vld [vmem:[%s966_s0 + $0x20] sm:$0xff]  ;;  %v664_v12 = vld [vmem:[%s964_s3 + $0x48] sm:$0xff]  ;;  %v689_v17 = vld [vmem:[%s964_s3 + $0x38] sm:$0xff] }
   0x6   :  { %139 = vmatpush.msra.mxu1 %v617_v2  ;;  %503 = vmatmul.msk.f32.vlgmr.msra.gmra.mxu0 %vm45_vm0, %v32_v5  ;;  %v370_v13 = vld [vmem:[%s967_s5 + $0x60] sm:$0xff]  ;;  %v37_v15 = vld [vmem:[%s966_s0 + $0x28] sm:$0xff]  ;;  %v368_v18 = vld [vmem:[%s967_s5 + $0x50] sm:$0xff] }
   0x7   :  { %507 = vmatmul.msk.f32.vlgmr.msra.gmra.mxu2 %vm45_vm0, %v36_v7  ;;  %166 = vmatpush.msra.mxu3 %v617_v2  ;;  %v675_v14 = vld [vmem:[%s964_s3 + $0x40] sm:$0xff]  ;;  %v700_v19 = vld [vmem:[%s964_s3 + $0x30] sm:$0xff]  ;;  %v367_v20 = vld [vmem:[%s967_s5 + $0x48] sm:$0xff] }
   0x8   :  { %140 = vmatpush.msra.mxu1 %v624_v3  ;;  %378 = vmatpush.msrb.mxu2 %v373_v8  ;;  %v711_v21 = vld [vmem:[%s964_s3 + $0x28] sm:$0xff]  ;;  %v366_v22 = vld [vmem:[%s967_s5 + $0x40] sm:$0xff]  ;;  %v38_v24 = vld [vmem:[%s966_s0 + $0x30] sm:$0xff] }
   0x9   :  { %245 = vmatpush.msrb.mxu0 %v605_v0  ;;  %167 = vmatpush.msra.mxu3 %v624_v3  ;;  %v722_v23 = vld [vmem:[%s964_s3 + $0x20] sm:$0xff]  ;;  %v365_v25 = vld [vmem:[%s967_s5 + $0x38] sm:$0xff]  ;;  %v364_v27 = vld [vmem:[%s967_s5 + $0x30] sm:$0xff] }
   0xa   :  { %141 = vmatpush.msra.mxu1 %v636_v6  ;;  %379 = vmatpush.msrb.mxu2 %v372_v9  ;;  %v736_v26 = vld [vmem:[%s964_s3 + $0x18] sm:$0xff]  ;;  %v747_v28 = vld [vmem:[%s964_s3 + $0x10] sm:$0xff]  ;;  %v755_v29 = vld [vmem:[%s964_s3 + $0x8] sm:$0xff] }
   0xb   :  { %246 = vmatpush.msrb.mxu0 %v610_v1  ;;  %168 = vmatpush.msra.mxu3 %v636_v6  ;;  %v763_v30 = vld [vmem:[%s964_s3] sm:$0xff]  ;;  %v363_v32 = vld [vmem:[%s967_s5 + $0x28] sm:$0xff]  ;;  %v39_v34 = vld [vmem:[%s966_s0 + $0x38] sm:$0xff] }
   0xc   :  { %142 = vmatpush.msra.mxu1 %v653_v10  ;;  %380 = vmatpush.msrb.mxu2 %v371_v11  ;;  %v30_v31 = vld [vmem:[%s969_s1] sm:$0xff]  ;;  %v361_v35 = vld [vmem:[%s967_s5 + $0x18] sm:$0xff]  ;;  %v360_v36 = vld [vmem:[%s967_s5 + $0x10] sm:$0xff] }
   0xd   :  { %247 = vmatpush.msrb.mxu0 %v617_v2  ;;  %169 = vmatpush.msra.mxu3 %v653_v10  ;;  %v362_v33 = vld [vmem:[%s967_s5 + $0x20] sm:$0xff]  ;;  %v359_v37 = vld [vmem:[%s967_s5 + $0x8] sm:$0xff]  ;;  %v34_v48 = vld [vmem:[%s966_s0 + $0x10] sm:$0xff] }
   0xe   :  { %143 = vmatpush.msra.mxu1 %v664_v12  ;;  %381 = vmatpush.msrb.mxu2 %v370_v13  ;;  %v358_v38 = vld [vmem:[%s967_s5] sm:$0xff]  ;;  %v33_v39 = vld [vmem:[%s966_s0 + $0x8] sm:$0xff]  ;;  %v35_v59 = vld [vmem:[%s966_s0 + $0x18] sm:$0xff] }
   0xf   :  { %508 = vmatmul.msk.f32.gmra.mxu2 %vm45_vm0, %v37_v15  ;;  %170 = vmatpush.msra.mxu3 %v664_v12  ;;  %v875_v40 = vld [vmem:[%s968_s4] ss:$0 sm:$0xff] }
  0x10   :  { %144 = vmatpush.msra.mxu1 %v675_v14  ;;  %382 = vmatpush.msrb.mxu2 %v369_v16  ;;  %v904_v53 = vld [vmem:[%s970_s6] ss:$0 sm:$0xff] }
  0x11   :  { %248 = vmatpush.msrb.mxu0 %v624_v3  ;;  %171 = vmatpush.msra.mxu3 %v675_v14 }
  0x12   :  { %145 = vmatpush.msra.mxu1 %v689_v17  ;;  %383 = vmatpush.msrb.mxu2 %v368_v18 }
  0x13   :  { %249 = vmatpush.msrb.mxu0 %v636_v6  ;;  %172 = vmatpush.msra.mxu3 %v689_v17 }
  0x14   :  { %146 = vmatpush.msra.mxu1 %v700_v19  ;;  %384 = vmatpush.msrb.mxu2 %v367_v20 }
  0x15   :  { %250 = vmatpush.msrb.mxu0 %v653_v10  ;;  %173 = vmatpush.msra.mxu3 %v700_v19 }
  0x16   :  { %147 = vmatpush.msra.mxu1 %v711_v21  ;;  %385 = vmatpush.msrb.mxu2 %v366_v22 }
  0x17   :  { %509 = vmatmul.msk.f32.gmra.mxu2 %vm45_vm0, %v38_v24  ;;  %174 = vmatpush.msra.mxu3 %v711_v21 }
  0x18   :  { %148 = vmatpush.msra.mxu1 %v722_v23  ;;  %386 = vmatpush.msrb.mxu2 %v365_v25 }
  0x19   :  { %251 = vmatpush.msrb.mxu0 %v664_v12  ;;  %175 = vmatpush.msra.mxu3 %v722_v23 }
  0x1a   :  { %149 = vmatpush.msra.mxu1 %v736_v26  ;;  %387 = vmatpush.msrb.mxu2 %v364_v27 }
  0x1b   :  { %252 = vmatpush.msrb.mxu0 %v675_v14  ;;  %176 = vmatpush.msra.mxu3 %v736_v26 }
  0x1c   :  { %150 = vmatpush.msra.mxu1 %v747_v28  ;;  %388 = vmatpush.msrb.mxu2 %v363_v32 }
  0x1d   :  { %253 = vmatpush.msrb.mxu0 %v689_v17  ;;  %177 = vmatpush.msra.mxu3 %v747_v28 }
  0x1e   :  { %151 = vmatpush.msra.mxu1 %v755_v29  ;;  %389 = vmatpush.msrb.mxu2 %v362_v33 }
  0x1f   :  { %254 = vmatpush.msrb.mxu0 %v700_v19  ;;  %178 = vmatpush.msra.mxu3 %v755_v29 }
  0x20   :  { %152 = vmatpush.msra.mxu1 %v763_v30  ;;  %510 = vmatmul.msk.f32.gmra.mxu2 %vm45_vm0, %v39_v34 }
  0x21   :  { %153 = vmatmul.f32.vlgmr.msra.gmra.mxu1 %v30_v31  ;;  %255 = vmatpush.msrb.mxu0 %v711_v21 }
  0x22   :  { %218 = vmatpush.msrb.mxu1 %v605_v0  ;;  %179 = vmatpush.msra.mxu3 %v763_v30 }
  0x23   :  { %256 = vmatpush.msrb.mxu0 %v722_v23  ;;  %390 = vmatpush.msrb.mxu2 %v361_v35 }
  0x24   :  { %191 = vmatpush.msrb.mxu3 %v605_v0  ;;  %219 = vmatpush.msrb.mxu1 %v610_v1 }
  0x25   :  { %257 = vmatpush.msrb.mxu0 %v736_v26  ;;  %391 = vmatpush.msrb.mxu2 %v360_v36 }
  0x26   :  { %192 = vmatpush.msrb.mxu3 %v610_v1  ;;  %220 = vmatpush.msrb.mxu1 %v617_v2 }
  0x27   :  { %258 = vmatpush.msrb.mxu0 %v747_v28  ;;  %392 = vmatpush.msrb.mxu2 %v359_v37 }
  0x28   :  { %193 = vmatpush.msrb.mxu3 %v617_v2  ;;  %221 = vmatpush.msrb.mxu1 %v624_v3 }
  0x29   :  { %259 = vmatpush.msrb.mxu0 %v755_v29  ;;  %393 = vmatpush.msrb.mxu2 %v358_v38 }
  0x2a   :  { %194 = vmatpush.msrb.mxu3 %v624_v3  ;;  %222 = vmatpush.msrb.mxu1 %v636_v6 }
  0x2b   :  { %260 = vmatpush.msrb.mxu0 %v763_v30 }
  0x2c   :  { %195 = vmatpush.msrb.mxu3 %v636_v6  ;;  %223 = vmatpush.msrb.mxu1 %v653_v10 }
  0x2d   :  { %299 = vmatpush.msra.mxu0 %v605_v0 }
  0x2e   :  { %196 = vmatpush.msrb.mxu3 %v653_v10  ;;  %224 = vmatpush.msrb.mxu1 %v664_v12 }
  0x2f   :  { %300 = vmatpush.msra.mxu0 %v610_v1 }
  0x30   :  { %197 = vmatpush.msrb.mxu3 %v664_v12  ;;  %225 = vmatpush.msrb.mxu1 %v675_v14 }
  0x31   :  { %301 = vmatpush.msra.mxu0 %v617_v2 }
  0x32   :  { %198 = vmatpush.msrb.mxu3 %v675_v14  ;;  %226 = vmatpush.msrb.mxu1 %v689_v17 }
  0x33   :  { %302 = vmatpush.msra.mxu0 %v624_v3 }
  0x34   :  { %199 = vmatpush.msrb.mxu3 %v689_v17  ;;  %227 = vmatpush.msrb.mxu1 %v700_v19 }
  0x35   :  { %303 = vmatpush.msra.mxu0 %v636_v6 }
  0x36   :  { %200 = vmatpush.msrb.mxu3 %v700_v19  ;;  %228 = vmatpush.msrb.mxu1 %v711_v21 }
  0x37   :  { %304 = vmatpush.msra.mxu0 %v653_v10 }
  0x38   :  { %201 = vmatpush.msrb.mxu3 %v711_v21  ;;  %229 = vmatpush.msrb.mxu1 %v722_v23 }
  0x39   :  { %305 = vmatpush.msra.mxu0 %v664_v12 }
  0x3a   :  { %202 = vmatpush.msrb.mxu3 %v722_v23  ;;  %230 = vmatpush.msrb.mxu1 %v736_v26 }
  0x3b   :  { %306 = vmatpush.msra.mxu0 %v675_v14 }
  0x3c   :  { %203 = vmatpush.msrb.mxu3 %v736_v26  ;;  %231 = vmatpush.msrb.mxu1 %v747_v28 }
  0x3d   :  { %307 = vmatpush.msra.mxu0 %v689_v17 }
  0x3e   :  { %204 = vmatpush.msrb.mxu3 %v747_v28  ;;  %232 = vmatpush.msrb.mxu1 %v755_v29 }
  0x3f   :  { %308 = vmatpush.msra.mxu0 %v700_v19 }
  0x40   :  { %205 = vmatpush.msrb.mxu3 %v755_v29  ;;  %233 = vmatpush.msrb.mxu1 %v763_v30 }
  0x41   :  { %309 = vmatpush.msra.mxu0 %v711_v21 }
  0x42   :  { %326 = vmatpush.msra.mxu1 %v605_v0  ;;  %206 = vmatpush.msrb.mxu3 %v763_v30 }
  0x43   :  { %310 = vmatpush.msra.mxu0 %v722_v23 }
  0x44   :  { %327 = vmatpush.msra.mxu1 %v610_v1  ;;  %504 = vmatmul.msk.f32.gmra.mxu0 %vm45_vm0, %v33_v39 }
  0x45   :  { %311 = vmatpush.msra.mxu0 %v736_v26 }
  0x46   :  { %328 = vmatpush.msra.mxu1 %v617_v2 }
  0x47   :  { %312 = vmatpush.msra.mxu0 %v747_v28 }
  0x48   :  { %329 = vmatpush.msra.mxu1 %v624_v3 }
  0x49   :  { %313 = vmatpush.msra.mxu0 %v755_v29 }
  0x4a   :  { %330 = vmatpush.msra.mxu1 %v636_v6 }
  0x4b   :  { %314 = vmatpush.msra.mxu0 %v763_v30 }
  0x4c   :  { %331 = vmatpush.msra.mxu1 %v653_v10  ;;  %505 = vmatmul.msk.f32.gmra.mxu0 %vm45_vm0, %v34_v48 }
  0x4e   :  { %332 = vmatpush.msra.mxu1 %v664_v12 }
  0x50   :  { %333 = vmatpush.msra.mxu1 %v675_v14 }
  0x52   :  { %334 = vmatpush.msra.mxu1 %v689_v17 }
  0x54   :  { %335 = vmatpush.msra.mxu1 %v700_v19  ;;  %506 = vmatmul.msk.f32.gmra.mxu0 %vm45_vm0, %v35_v59 }
  0x56   :  { %336 = vmatpush.msra.mxu1 %v711_v21 }
  0x58   :  { %337 = vmatpush.msra.mxu1 %v722_v23 }
  0x5a   :  { %338 = vmatpush.msra.mxu1 %v736_v26 }
  0x5c   :  { %339 = vmatpush.msra.mxu1 %v747_v28 }
  0x5e   :  { %340 = vmatpush.msra.mxu1 %v755_v29 }
  0x60   :  { %341 = vmatpush.msra.mxu1 %v763_v30 }
  0x83   :  { %v87_v41 = vpop.f32.mrf.mxu0 }
  0x84   :  { %v88_v42 = vadd.f32 %v875_v40, %v87_v41 }
  0x8a   :  { %v99_v46 = vpop.f32.mrf.mxu2 }
  0x92   :  { %v102_v47 = vpop.f32.mrf.mxu2 }
  0x93   :  { %v103_v16 = vadd.f32 %v875_v40, %v102_v47 }
  0x9a   :  { %v105_v49 = vpop.f32.mrf.mxu2 }
  0x9b   :  { %v106_v22 = vadd.f32 %v875_v40, %v105_v49 }
  0x9e   :  { %v154_v43 = vpop.f32.mrf.mxu1 }
  0x9f   :  { %v157_v44 = vadd.f32 %v154_v43, %v88_v42 }
  0xa1   :  { %514 = vtanh.f32 %v157_v44 }
  0xa3   :  { %v898_v50 = vpop.f32.mrf.mxu2 }
  0xa4   :  { %v109_v39 = vadd.f32 %v875_v40, %v898_v50 }
  0xa7   :  { %v515_v45 = vpop.eup %514 }
  0xa8   :  { %180 = vmatmul.f32.vlgmr.msra.gmra.mxu3 %v515_v45  ;;  %394 = vmatmul.f32.vlgmr.msrb.gmra.mxu2 %v515_v45 }
  0xa9   :  { %272 = vmatpush.msra.mxu3 %v605_v0 }
  0xab   :  { %273 = vmatpush.msra.mxu3 %v610_v1 }
  0xad   :  { %274 = vmatpush.msra.mxu3 %v617_v2 }
  0xaf   :  { %275 = vmatpush.msra.mxu3 %v624_v3 }
  0xb1   :  { %276 = vmatpush.msra.mxu3 %v636_v6 }
  0xb3   :  { %277 = vmatpush.msra.mxu3 %v653_v10  ;;  %v100_v10 = vadd.f32 %v875_v40, %v99_v46 }
  0xb5   :  { %278 = vmatpush.msra.mxu3 %v664_v12 }
  0xb7   :  { %279 = vmatpush.msra.mxu3 %v675_v14 }
  0xb9   :  { %280 = vmatpush.msra.mxu3 %v689_v17 }
  0xbb   :  { %281 = vmatpush.msra.mxu3 %v700_v19 }
  0xbd   :  { %282 = vmatpush.msra.mxu3 %v711_v21 }
  0xbf   :  { %283 = vmatpush.msra.mxu3 %v722_v23 }
  0xc1   :  { %284 = vmatpush.msra.mxu3 %v736_v26  ;;  %v90_v51 = vpop.f32.mrf.mxu0 }
  0xc2   :  { %v91_v52 = vadd.f32 %v875_v40, %v90_v51 }
  0xc3   :  { %285 = vmatpush.msra.mxu3 %v747_v28 }
  0xc5   :  { %286 = vmatpush.msra.mxu3 %v755_v29 }
  0xc7   :  { %287 = vmatpush.msra.mxu3 %v763_v30 }
  0xc9   :  { %v93_v60 = vpop.f32.mrf.mxu0 }
  0xca   :  { %v94_v61 = vadd.f32 %v875_v40, %v93_v60 }
  0xd1   :  { %v96_v3 = vpop.f32.mrf.mxu0 }
  0xd2   :  { %v97_v4 = vadd.f32 %v875_v40, %v96_v3 }
 0x12b   :  { %v181_v54 = vpop.f32.mrf.mxu3  ;;  %v395_v55 = vpop.f32.mrf.mxu2 }
 0x12c   :  { %v184_v56 = vadd.f32 %v181_v54, %v91_v52  ;;  %v396_v57 = vadd.f32 %v904_v53, %v395_v55 }
 0x12e   :  { %516 = vtanh.f32 %v184_v56  ;;  %419 = vmax.xlane.f32.xlu0 %v396_v57 }
 0x134   :  { %v517_v58 = vpop.eup %516 }
 0x135   :  { %207 = vmatmul.f32.vlgmr.msrb.gmra.mxu3 %v517_v58  ;;  %397 = vmatmul.f32.gmra.mxu2 %v517_v58 }
 0x1a1   :  { %v420_v23 = vpop.xlane.xlu0 %419 }
 0x1a2   :  { %v435_v27 = vsub.f32 %v396_v57, %v420_v23 }
 0x1a4   :  { %v443_v28 = vmul.f32 1.442695, %v435_v27 }
 0x1b8   :  { %v208_v62 = vpop.f32.mrf.mxu3  ;;  %v398_v63 = vpop.f32.mrf.mxu2 }
 0x1b9   :  { %v211_v0 = vadd.f32 %v208_v62, %v94_v61  ;;  %v913_v1 = vadd.f32 %v904_v53, %v398_v63 }
 0x1bb   :  { %518 = vtanh.f32 %v211_v0  ;;  %421 = vmax.xlane.f32.xlu0 %v913_v1 }
 0x1c1   :  { %v519_v2 = vpop.eup %518 }
 0x1c2   :  { %234 = vmatmul.f32.vlgmr.msrb.gmra.mxu1 %v519_v2  ;;  %400 = vmatmul.f32.gmra.mxu2 %v519_v2 }
 0x22e   :  { %v422_v42 = vpop.xlane.xlu0 %421 }
 0x22f   :  { %v436_v45 = vsub.f32 %v913_v1, %v422_v42 }
 0x231   :  { %v445_v49 = vmul.f32 1.442695, %v436_v45 }
 0x23f   :  { %v235_v5 = vpop.f32.mrf.mxu1 }
 0x240   :  { %v238_v6 = vadd.f32 %v235_v5, %v97_v4 }
 0x242   :  { %520 = vtanh.f32 %v238_v6 }
 0x245   :  { %v401_v7 = vpop.f32.mrf.mxu2 }
 0x246   :  { %v918_v8 = vadd.f32 %v904_v53, %v401_v7 }
 0x248   :  { %v521_v9 = vpop.eup %520  ;;  %423 = vmax.xlane.f32.xlu1 %v918_v8 }
 0x249   :  { %261 = vmatmul.f32.vlgmr.msrb.gmra.mxu0 %v521_v9  ;;  %403 = vmatmul.f32.gmra.mxu2 %v521_v9 }
 0x2bb   :  { %v926_v24 = vpop.xlane.xlu1 %423 }
 0x2bc   :  { %v437_v0 = vsub.f32 %v918_v8, %v926_v24 }
 0x2be   :  { %v447_v4 = vmul.f32 1.442695, %v437_v0 }
 0x2c6   :  { %v262_v11 = vpop.f32.mrf.mxu0 }
 0x2c7   :  { %v265_v12 = vadd.f32 %v262_v11, %v100_v10 }
 0x2c9   :  { %522 = vtanh.f32 %v265_v12 }
 0x2cc   :  { %v404_v13 = vpop.f32.mrf.mxu2 }
 0x2cd   :  { %v405_v14 = vadd.f32 %v904_v53, %v404_v13 }
 0x2cf   :  { %v523_v15 = vpop.eup %522  ;;  %425 = vmax.xlane.f32.xlu1 %v405_v14 }
 0x2d0   :  { %288 = vmatmul.f32.vlgmr.msra.gmra.mxu3 %v523_v15  ;;  %406 = vmatmul.f32.gmra.mxu2 %v523_v15 }
 0x342   :  { %v426_v30 = vpop.xlane.xlu1 %425 }
 0x343   :  { %v438_v33 = vsub.f32 %v405_v14, %v426_v30 }
 0x345   :  { %v449_v34 = vmul.f32 1.442695, %v438_v33 }
 0x353   :  { %v289_v17 = vpop.f32.mrf.mxu3  ;;  %v407_v18 = vpop.f32.mrf.mxu2 }
 0x354   :  { %v292_v19 = vadd.f32 %v289_v17, %v103_v16  ;;  %v408_v20 = vadd.f32 %v904_v53, %v407_v18 }
 0x356   :  { %524 = vtanh.f32 %v292_v19  ;;  %427 = vmax.xlane.f32.xlu2 %v408_v20 }
 0x35c   :  { %v525_v21 = vpop.eup %524 }
 0x35d   :  { %315 = vmatmul.f32.vlgmr.msra.gmra.mxu0 %v525_v21  ;;  %409 = vmatmul.f32.gmra.mxu2 %v525_v21 }
 0x3c9   :  { %v428_v37 = vpop.xlane.xlu2 %427 }
 0x3ca   :  { %v439_v52 = vsub.f32 %v408_v20, %v428_v37 }
 0x3cc   :  { %v451_v56 = vmul.f32 1.442695, %v439_v52 }
 0x3da   :  { %v316_v25 = vpop.f32.mrf.mxu0 }
 0x3db   :  { %v319_v26 = vadd.f32 %v316_v25, %v106_v22 }
 0x3dd   :  { %526 = vtanh.f32 %v319_v26 }
 0x3de   :  { %528 = vpow2.f32 %v443_v28 }
 0x3df   :  { %530 = vpow2.f32 %v449_v34 }
 0x3e0   :  { %v410_v29 = vpop.f32.mrf.mxu2 }
 0x3e1   :  { %v929_v31 = vadd.f32 %v904_v53, %v410_v29 }
 0x3e3   :  { %v527_v32 = vpop.eup %526  ;;  %429 = vmax.xlane.f32.xlu2 %v929_v31 }
 0x3e4   :  { %342 = vmatmul.f32.vlgmr.msra.gmra.mxu1 %v527_v32  ;;  %412 = vmatmul.f32.gmra.mxu2 %v527_v32  ;;  %v529_v35 = vpop.eup %528 }
 0x3e5   :  { %v531_v36 = vpop.eup %530 }
 0x3eb   :  { %459 = vadd.xlane.f32.xlu2 %v529_v35 }
 0x3f3   :  { %465 = vadd.xlane.f32.xlu2 %v531_v36 }
 0x456   :  { %v430_v38 = vpop.xlane.xlu2 %429 }
 0x457   :  { %v440_v7 = vsub.f32 %v929_v31, %v430_v38 }
 0x459   :  { %v453_v11 = vmul.f32 1.442695, %v440_v7 }
 0x45e   :  { %v460_v41 = vpop.xlane.xlu2 %459 }
 0x45f   :  { %532 = vrcp.f32 %v460_v41 }
 0x461   :  { %v343_v43 = vpop.f32.mrf.mxu1 }
 0x462   :  { %v346_v44 = vadd.f32 %v343_v43, %v109_v39 }
 0x464   :  { %534 = vtanh.f32 %v346_v44 }
 0x465   :  { %v533_v46 = vpop.eup %532 }
 0x466   :  { %v483_v47 = vmul.f32 %v533_v46, %v529_v35  ;;  %v466_v48 = vpop.xlane.xlu2 %465 }
 0x467   :  { %536 = vrcp.f32 %v466_v48  ;;  %v413_v51 = vpop.f32.mrf.mxu2 }
 0x468   :  { %491 = vst [vmem:[%s971_s7] sm:$0xff] %v483_v47  ;;  %v414_v40 = vadd.f32 %v904_v53, %v413_v51  ;;  %538 = vpow2.f32 %v445_v49 }
 0x469   :  { %540 = vpow2.f32 %v451_v56 }
 0x46a   :  { %v535_v50 = vpop.eup %534  ;;  %431 = vmax.xlane.f32.xlu0 %v414_v40 }
 0x46b   :  { %415 = vmatmul.f32.gmra.mxu2 %v535_v50 }
 0x46d   :  { %v537_v54 = vpop.eup %536 }
 0x46e   :  { %v486_v55 = vmul.f32 %v537_v54, %v531_v36  ;;  %v539_v57 = vpop.eup %538 }
 0x46f   :  { %v541_v58 = vpop.eup %540 }
 0x470   :  { %494 = vst [vmem:[%s971_s7 + $0x18] sm:$0xff] %v486_v55 }
 0x472   :  { %461 = vadd.xlane.f32.xlu0 %v539_v57 }
 0x47a   :  { %467 = vadd.xlane.f32.xlu0 %v541_v58 }
 0x4dd   :  { %v432_v59 = vpop.xlane.xlu0 %431 }
 0x4de   :  { %v441_v60 = vsub.f32 %v414_v40, %v432_v59 }
 0x4e0   :  { %v455_v61 = vmul.f32 1.442695, %v441_v60 }
 0x4e2   :  { %542 = vpow2.f32 %v455_v61 }
 0x4e5   :  { %v462_v62 = vpop.xlane.xlu0 %461 }
 0x4e6   :  { %544 = vrcp.f32 %v462_v62 }
 0x4e8   :  { %v543_v63 = vpop.eup %542 }
 0x4e9   :  { %471 = vadd.xlane.f32.xlu2 %v543_v63 }
 0x4ec   :  { %v545_v1 = vpop.eup %544 }
 0x4ed   :  { %v484_v2 = vmul.f32 %v545_v1, %v539_v57  ;;  %v468_v3 = vpop.xlane.xlu0 %467 }
 0x4ee   :  { %546 = vrcp.f32 %v468_v3  ;;  %v416_v5 = vpop.f32.mrf.mxu2 }
 0x4ef   :  { %492 = vst [vmem:[%s971_s7 + $0x8] sm:$0xff] %v484_v2  ;;  %v417_v6 = vadd.f32 %v904_v53, %v416_v5  ;;  %548 = vpow2.f32 %v447_v4 }
 0x4f0   :  { %550 = vpow2.f32 %v453_v11 }
 0x4f1   :  { %433 = vmax.xlane.f32.xlu1 %v417_v6 }
 0x4f4   :  { %v547_v9 = vpop.eup %546 }
 0x4f5   :  { %v487_v10 = vmul.f32 %v547_v9, %v541_v58  ;;  %v549_v8 = vpop.eup %548 }
 0x4f6   :  { %v551_v12 = vpop.eup %550 }
 0x4f7   :  { %495 = vst [vmem:[%s971_s7 + $0x20] sm:$0xff] %v487_v10 }
 0x4f9   :  { %463 = vadd.xlane.f32.xlu1 %v549_v8 }
 0x501   :  { %469 = vadd.xlane.f32.xlu1 %v551_v12 }
 0x55c   :  { %v472_v13 = vpop.xlane.xlu2 %471 }
 0x55d   :  { %552 = vrcp.f32 %v472_v13 }
 0x563   :  { %v553_v14 = vpop.eup %552 }
 0x564   :  { %v489_v53 = vmul.f32 %v553_v14, %v543_v63  ;;  %v434_v15 = vpop.xlane.xlu1 %433 }
 0x565   :  { %v442_v16 = vsub.f32 %v417_v6, %v434_v15 }
 0x566   :  { %497 = vst [vmem:[%s971_s7 + $0x30] sm:$0xff] %v489_v53 }
 0x567   :  { %v457_v17 = vmul.f32 1.442695, %v442_v16 }
 0x569   :  { %554 = vpow2.f32 %v457_v17 }
 0x56c   :  { %v464_v18 = vpop.xlane.xlu1 %463 }
 0x56d   :  { %556 = vrcp.f32 %v464_v18 }
 0x56f   :  { %v555_v19 = vpop.eup %554 }
 0x570   :  { %473 = vadd.xlane.f32.xlu0 %v555_v19 }
 0x573   :  { %v557_v20 = vpop.eup %556 }
 0x574   :  { %v485_v21 = vmul.f32 %v557_v20, %v549_v8  ;;  %v470_v22 = vpop.xlane.xlu1 %469 }
 0x575   :  { %558 = vrcp.f32 %v470_v22 }
 0x576   :  { %493 = vst [vmem:[%s971_s7 + $0x10] sm:$0xff] %v485_v21 }
 0x57b   :  { %v559_v23 = vpop.eup %558 }
 0x57c   :  { %v488_v24 = vmul.f32 %v559_v23, %v551_v12 }
 0x57e   :  { %496 = vst [vmem:[%s971_s7 + $0x28] sm:$0xff] %v488_v24 }
 0x5e3   :  { %v474_v25 = vpop.xlane.xlu0 %473 }
 0x5e4   :  { %560 = vrcp.f32 %v474_v25 }
 0x5ea   :  { %v561_v26 = vpop.eup %560 }
 0x5eb   :  { %v490_v27 = vmul.f32 %v561_v26, %v555_v19 }
 0x5ed   :  { %498 = vst [vmem:[%s971_s7 + $0x38] sm:$0xff] %v490_v27 }

</bundles_post_ra>
